<compile_context>
chip_gen: v5e
topology: v5e:2x2
jax: 0.10.0
libtpu: 0.0.40
codegen_flags: <defaults>
</compile_context>

<pallas_src>
import functools

import jax
import jax.numpy as jnp
from jax.experimental import pallas as pl
from jax.experimental.pallas import tpu as pltpu

LN_EPS = 1e-5       # PyTorch nn.LayerNorm default
LANE = 128          # TPU lane width  -> lane-dense output padding
SUBLANE = 8         # f32 sublane width -> batch padding granularity


def _round_up(x, m):
    return ((x + m - 1) // m) * m


def _layernorm(h, gamma, beta):
    mean = jnp.mean(h, axis=-1, keepdims=True)
    var = jnp.mean(jnp.square(h - mean), axis=-1, keepdims=True)  # biased, like torch
    inv = jax.lax.rsqrt(var + LN_EPS)
    return (h - mean) * inv * gamma + beta


def actor_kernel(x_ref,
                 w1_ref, v1_ref,      # v1 = [bias; gamma; beta] for layer 1
                 w2_ref, v2_ref,      # v2 = [bias; gamma; beta] for layer 2
                 w3_ref, b3_ref,      # mu head (output-padded to LANE columns)
                 out_ref):
    x = x_ref[...]                                                   # (TB, D_in)

    # Layer 1: Linear -> LayerNorm -> ReLU
    h1 = jnp.dot(x, w1_ref[...], preferred_element_type=jnp.float32) + v1_ref[0:1, :]
    h1 = _layernorm(h1, v1_ref[1:2, :], v1_ref[2:3, :])
    h1 = jnp.maximum(h1, 0.0)

    # Layer 2: Linear -> LayerNorm -> ReLU
    h2 = jnp.dot(h1, w2_ref[...], preferred_element_type=jnp.float32) + v2_ref[0:1, :]
    h2 = _layernorm(h2, v2_ref[1:2, :], v2_ref[2:3, :])
    h2 = jnp.maximum(h2, 0.0)

    # Output head: Linear -> tanh (lane-dense store, padding columns are zeros)
    a = jnp.dot(h2, w3_ref[...], preferred_element_type=jnp.float32) + b3_ref[...]
    out_ref[...] = jnp.tanh(a)


@functools.partial(jax.jit, static_argnames=("max_batch_tile",))
def actor_forward(state, params, *, max_batch_tile=1024):
    """state: (B, *input_dims) float32. Returns (B, n_actions) float32."""
    (w1, b1, g1, be1, w2, b2, g2, be2, w3, b3) = params

    B = state.shape[0]
    x = state.reshape(B, -1)                                          # nn.Flatten
    d_in = x.shape[1]
    hl_one = w1.shape[1]
    hl_two = w2.shape[1]
    n_act = w3.shape[1]

    # --- batch tiling: one big tile for small B, 1024-row tiles otherwise ----
    batch_tile = min(_round_up(B, SUBLANE), max_batch_tile)
    B_pad = _round_up(B, batch_tile)
    if B_pad != B:
        x = jnp.pad(x, ((0, B_pad - B), (0, 0)))     # zero rows, sliced off below
    grid = (B_pad // batch_tile,)

    # --- lane-dense output: pad mu head to LANE output columns ---------------
    n_out = _round_up(n_act, LANE)
    w3p = jnp.pad(w3, ((0, 0), (0, n_out - n_act)))
    b3p = jnp.pad(b3, ((0, 0), (0, n_out - n_act)))

    # --- pack per-layer (bias, gamma, beta) into a single array each ---------
    v1 = jnp.concatenate([b1, g1, be1], axis=0)       # (3, hl_one)
    v2 = jnp.concatenate([b2, g2, be2], axis=0)       # (3, hl_two)

    full = lambda shape: pl.BlockSpec(shape, lambda i: (0, 0))  # constant block
                                                                # index -> not re-DMA'd

    flops = 2 * B_pad * (d_in * hl_one + hl_one * hl_two + hl_two * n_out)
    transcendentals = B_pad * (hl_one + hl_two + n_out)          # rsqrt x2 + tanh
    bytes_accessed = 4 * (x.size + B_pad * n_out
                          + w1.size + v1.size + w2.size + v2.size
                          + w3p.size + b3p.size)

    out = pl.pallas_call(
        actor_kernel,
        out_shape=jax.ShapeDtypeStruct((B_pad, n_out), jnp.float32),
        grid_spec=pltpu.PrefetchScalarGridSpec(
            num_scalar_prefetch=0,
            grid=grid,
            in_specs=[
                pl.BlockSpec((batch_tile, d_in), lambda i: (i, 0)),   # x tile
                full((d_in, hl_one)),                                 # w1
                full((3, hl_one)),                                    # b1/g1/be1
                full((hl_one, hl_two)),                               # w2
                full((3, hl_two)),                                    # b2/g2/be2
                full((hl_two, n_out)),                                # w3 (padded)
                full((1, n_out)),                                     # b3 (padded)
            ],
            out_specs=pl.BlockSpec((batch_tile, n_out), lambda i: (i, 0)),
        ),
        compiler_params=pltpu.CompilerParams(
            dimension_semantics=("parallel",)),
        cost_estimate=pl.CostEstimate(
            flops=flops,
            transcendentals=transcendentals,
            bytes_accessed=bytes_accessed),
    )(x, w1, v1, w2, v2, w3p, b3p)

    return out[:B, :n_act]


def init_params(key, input_dim, hl_one, hl_two, n_actions):
    """Deterministic init matching the PyTorch module's scheme:
       - input/hidden Linear: U(-1/sqrt(fan_in), 1/sqrt(fan_in))
       - mu Linear: U(-0.003, 0.003)
       - LayerNorm: gamma=1, beta=0 (PyTorch default)."""
    ks = jax.random.split(key, 6)

    f1 = 1.0 / jnp.sqrt(jnp.float32(input_dim))
    w1 = jax.random.uniform(ks[0], (input_dim, hl_one), jnp.float32, -f1, f1)
    b1 = jax.random.uniform(ks[1], (1, hl_one), jnp.float32, -f1, f1)

    f2 = 1.0 / jnp.sqrt(jnp.float32(hl_one))
    w2 = jax.random.uniform(ks[2], (hl_one, hl_two), jnp.float32, -f2, f2)
    b2 = jax.random.uniform(ks[3], (1, hl_two), jnp.float32, -f2, f2)

    f3 = 0.003
    w3 = jax.random.uniform(ks[4], (hl_two, n_actions), jnp.float32, -f3, f3)
    b3 = jax.random.uniform(ks[5], (1, n_actions), jnp.float32, -f3, f3)

    g1 = jnp.ones((1, hl_one), jnp.float32)
    be1 = jnp.zeros((1, hl_one), jnp.float32)
    g2 = jnp.ones((1, hl_two), jnp.float32)
    be2 = jnp.zeros((1, hl_two), jnp.float32)

    return (w1, b1, g1, be1, w2, b2, g2, be2, w3, b3)


def reference_forward(state, params):
    """Plain-JAX reference mirroring the PyTorch forward pass."""
    (w1, b1, g1, be1, w2, b2, g2, be2, w3, b3) = params
    x = state.reshape(state.shape[0], -1)
    h = x @ w1 + b1
    h = _layernorm(h, g1, be1)
    h = jnp.maximum(h, 0.0)
    h = h @ w2 + b2
    h = _layernorm(h, g2, be2)
    h = jnp.maximum(h, 0.0)
    return jnp.tanh(h @ w3 + b3)


if __name__ == "__main__":
    # LunarLanderContinuous-like dims: obs=8, actions=2; small hidden layers.
    # B=10 deliberately exercises the cdiv + zero-padding path (not a multiple of 8).
    B, INPUT_DIM, HL_ONE, HL_TWO, N_ACTIONS = 10, 8, 64, 32, 2

    key = jax.random.PRNGKey(0)
    k_state, k_params = jax.random.split(key)

    state = jax.random.normal(k_state, (B, INPUT_DIM), jnp.float32)
    params = init_params(k_params, INPUT_DIM, HL_ONE, HL_TWO, N_ACTIONS)

    out = actor_forward(state, params)
    out = jax.block_until_ready(out)

    ref = reference_forward(state, params)
    assert out.shape == (B, N_ACTIONS)
    assert jnp.allclose(out, ref, atol=1e-5, rtol=1e-5), "Pallas kernel mismatch vs reference"

    print("KERNEL_OK")
</pallas_src>

<mosaic_0001>
module attributes {stable_mosaic.version = 11 : i64} {
  func.func @actor_kernel(%arg0: i32, %arg1: memref<16x8xf32, #tpu.memory_space<vmem>>, %arg2: memref<8x64xf32, #tpu.memory_space<vmem>>, %arg3: memref<3x64xf32, #tpu.memory_space<vmem>>, %arg4: memref<64x32xf32, #tpu.memory_space<vmem>>, %arg5: memref<3x32xf32, #tpu.memory_space<vmem>>, %arg6: memref<32x128xf32, #tpu.memory_space<vmem>>, %arg7: memref<1x128xf32, #tpu.memory_space<vmem>>, %arg8: memref<16x128xf32, #tpu.memory_space<vmem>>) attributes {dimension_semantics = [#tpu.dimension_semantics<parallel>], iteration_bounds = array<i64: 1>, scalar_prefetch = 0 : i64, scratch_operands = 0 : i64, tpu.core_type = #tpu.core_type<tc>, window_params = [{transform_indices = @transform_0, window_bounds = array<i64: 16, 8>}, {pipeline_mode = #tpu.pipeline_mode<synchronous>, transform_indices = @transform_1, window_bounds = array<i64: 8, 64>}, {pipeline_mode = #tpu.pipeline_mode<synchronous>, transform_indices = @transform_2, window_bounds = array<i64: 3, 64>}, {pipeline_mode = #tpu.pipeline_mode<synchronous>, transform_indices = @transform_3, window_bounds = array<i64: 64, 32>}, {pipeline_mode = #tpu.pipeline_mode<synchronous>, transform_indices = @transform_4, window_bounds = array<i64: 3, 32>}, {pipeline_mode = #tpu.pipeline_mode<synchronous>, transform_indices = @transform_5, window_bounds = array<i64: 32, 128>}, {pipeline_mode = #tpu.pipeline_mode<synchronous>, transform_indices = @transform_6, window_bounds = array<i64: 1, 128>}, {transform_indices = @transform_7, window_bounds = array<i64: 16, 128>}]} {
    %c0 = arith.constant 0 : index
    %c0_0 = arith.constant 0 : index
    %0 = vector.load %arg1[%c0, %c0_0] : memref<16x8xf32, #tpu.memory_space<vmem>>, vector<16x8xf32>
    %c0_1 = arith.constant 0 : index
    %c0_2 = arith.constant 0 : index
    %1 = vector.load %arg2[%c0_1, %c0_2] : memref<8x64xf32, #tpu.memory_space<vmem>>, vector<8x64xf32>
    %cst = arith.constant dense<0.000000e+00> : vector<16x64xf32>
    %2 = tpu.matmul %0, %1, %cst {dimension_numbers = #tpu.dot_dimension_numbers<[1], [0], [0], [1], [0, 0, 1, 1], [], []>} : vector<16x8xf32>, vector<8x64xf32>, vector<16x64xf32> -> vector<16x64xf32>
    %c0_3 = arith.constant 0 : index
    %c0_4 = arith.constant 0 : index
    %3 = vector.load %arg3[%c0_3, %c0_4] : memref<3x64xf32, #tpu.memory_space<vmem>>, vector<1x64xf32>
    %4 = vector.broadcast %3 : vector<1x64xf32> to vector<16x64xf32>
    %5 = arith.addf %2, %4 : vector<16x64xf32>
    %c1 = arith.constant 1 : index
    %c0_5 = arith.constant 0 : index
    %6 = vector.load %arg3[%c1, %c0_5] : memref<3x64xf32, #tpu.memory_space<vmem>>, vector<1x64xf32>
    %c2 = arith.constant 2 : index
    %c0_6 = arith.constant 0 : index
    %7 = vector.load %arg3[%c2, %c0_6] : memref<3x64xf32, #tpu.memory_space<vmem>>, vector<1x64xf32>
    %cst_7 = arith.constant dense<0.000000e+00> : vector<16xf32>
    %8 = vector.multi_reduction <add>, %5, %cst_7 [1] : vector<16x64xf32> to vector<16xf32>
    %9 = vector.shape_cast %8 : vector<16xf32> to vector<16x1xf32>
    %cst_8 = arith.constant 6.400000e+01 : f32
    %10 = vector.broadcast %cst_8 : f32 to vector<16x1xf32>
    %11 = arith.divf %9, %10 : vector<16x1xf32>
    %12 = vector.broadcast %11 : vector<16x1xf32> to vector<16x64xf32>
    %13 = arith.subf %5, %12 : vector<16x64xf32>
    %14 = arith.mulf %13, %13 : vector<16x64xf32>
    %cst_9 = arith.constant dense<0.000000e+00> : vector<16xf32>
    %15 = vector.multi_reduction <add>, %14, %cst_9 [1] : vector<16x64xf32> to vector<16xf32>
    %16 = vector.shape_cast %15 : vector<16xf32> to vector<16x1xf32>
    %cst_10 = arith.constant 6.400000e+01 : f32
    %17 = vector.broadcast %cst_10 : f32 to vector<16x1xf32>
    %18 = arith.divf %16, %17 : vector<16x1xf32>
    %cst_11 = arith.constant 9.99999974E-6 : f32
    %19 = vector.broadcast %cst_11 : f32 to vector<16x1xf32>
    %20 = arith.addf %18, %19 : vector<16x1xf32>
    %21 = math.rsqrt %20 : vector<16x1xf32>
    %22 = vector.broadcast %11 : vector<16x1xf32> to vector<16x64xf32>
    %23 = arith.subf %5, %22 : vector<16x64xf32>
    %24 = vector.broadcast %21 : vector<16x1xf32> to vector<16x64xf32>
    %25 = arith.mulf %23, %24 : vector<16x64xf32>
    %26 = vector.broadcast %6 : vector<1x64xf32> to vector<16x64xf32>
    %27 = arith.mulf %25, %26 : vector<16x64xf32>
    %28 = vector.broadcast %7 : vector<1x64xf32> to vector<16x64xf32>
    %29 = arith.addf %27, %28 : vector<16x64xf32>
    %cst_12 = arith.constant 0.000000e+00 : f32
    %30 = vector.broadcast %cst_12 : f32 to vector<16x64xf32>
    %31 = arith.maximumf %29, %30 : vector<16x64xf32>
    %c0_13 = arith.constant 0 : index
    %c0_14 = arith.constant 0 : index
    %32 = vector.load %arg4[%c0_13, %c0_14] : memref<64x32xf32, #tpu.memory_space<vmem>>, vector<64x32xf32>
    %cst_15 = arith.constant dense<0.000000e+00> : vector<16x32xf32>
    %33 = tpu.matmul %31, %32, %cst_15 {dimension_numbers = #tpu.dot_dimension_numbers<[1], [0], [0], [1], [0, 0, 1, 1], [], []>} : vector<16x64xf32>, vector<64x32xf32>, vector<16x32xf32> -> vector<16x32xf32>
    %c0_16 = arith.constant 0 : index
    %c0_17 = arith.constant 0 : index
    %34 = vector.load %arg5[%c0_16, %c0_17] : memref<3x32xf32, #tpu.memory_space<vmem>>, vector<1x32xf32>
    %35 = vector.broadcast %34 : vector<1x32xf32> to vector<16x32xf32>
    %36 = arith.addf %33, %35 : vector<16x32xf32>
    %c1_18 = arith.constant 1 : index
    %c0_19 = arith.constant 0 : index
    %37 = vector.load %arg5[%c1_18, %c0_19] : memref<3x32xf32, #tpu.memory_space<vmem>>, vector<1x32xf32>
    %c2_20 = arith.constant 2 : index
    %c0_21 = arith.constant 0 : index
    %38 = vector.load %arg5[%c2_20, %c0_21] : memref<3x32xf32, #tpu.memory_space<vmem>>, vector<1x32xf32>
    %cst_22 = arith.constant dense<0.000000e+00> : vector<16xf32>
    %39 = vector.multi_reduction <add>, %36, %cst_22 [1] : vector<16x32xf32> to vector<16xf32>
    %40 = vector.shape_cast %39 : vector<16xf32> to vector<16x1xf32>
    %cst_23 = arith.constant 3.200000e+01 : f32
    %41 = vector.broadcast %cst_23 : f32 to vector<16x1xf32>
    %42 = arith.divf %40, %41 : vector<16x1xf32>
    %43 = vector.broadcast %42 : vector<16x1xf32> to vector<16x32xf32>
    %44 = arith.subf %36, %43 : vector<16x32xf32>
    %45 = arith.mulf %44, %44 : vector<16x32xf32>
    %cst_24 = arith.constant dense<0.000000e+00> : vector<16xf32>
    %46 = vector.multi_reduction <add>, %45, %cst_24 [1] : vector<16x32xf32> to vector<16xf32>
    %47 = vector.shape_cast %46 : vector<16xf32> to vector<16x1xf32>
    %cst_25 = arith.constant 3.200000e+01 : f32
    %48 = vector.broadcast %cst_25 : f32 to vector<16x1xf32>
    %49 = arith.divf %47, %48 : vector<16x1xf32>
    %cst_26 = arith.constant 9.99999974E-6 : f32
    %50 = vector.broadcast %cst_26 : f32 to vector<16x1xf32>
    %51 = arith.addf %49, %50 : vector<16x1xf32>
    %52 = math.rsqrt %51 : vector<16x1xf32>
    %53 = vector.broadcast %42 : vector<16x1xf32> to vector<16x32xf32>
    %54 = arith.subf %36, %53 : vector<16x32xf32>
    %55 = vector.broadcast %52 : vector<16x1xf32> to vector<16x32xf32>
    %56 = arith.mulf %54, %55 : vector<16x32xf32>
    %57 = vector.broadcast %37 : vector<1x32xf32> to vector<16x32xf32>
    %58 = arith.mulf %56, %57 : vector<16x32xf32>
    %59 = vector.broadcast %38 : vector<1x32xf32> to vector<16x32xf32>
    %60 = arith.addf %58, %59 : vector<16x32xf32>
    %cst_27 = arith.constant 0.000000e+00 : f32
    %61 = vector.broadcast %cst_27 : f32 to vector<16x32xf32>
    %62 = arith.maximumf %60, %61 : vector<16x32xf32>
    %c0_28 = arith.constant 0 : index
    %c0_29 = arith.constant 0 : index
    %63 = vector.load %arg6[%c0_28, %c0_29] : memref<32x128xf32, #tpu.memory_space<vmem>>, vector<32x128xf32>
    %cst_30 = arith.constant dense<0.000000e+00> : vector<16x128xf32>
    %64 = tpu.matmul %62, %63, %cst_30 {dimension_numbers = #tpu.dot_dimension_numbers<[1], [0], [0], [1], [0, 0, 1, 1], [], []>} : vector<16x32xf32>, vector<32x128xf32>, vector<16x128xf32> -> vector<16x128xf32>
    %c0_31 = arith.constant 0 : index
    %c0_32 = arith.constant 0 : index
    %65 = vector.load %arg7[%c0_31, %c0_32] : memref<1x128xf32, #tpu.memory_space<vmem>>, vector<1x128xf32>
    %66 = vector.broadcast %65 : vector<1x128xf32> to vector<16x128xf32>
    %67 = arith.addf %64, %66 : vector<16x128xf32>
    %68 = math.tanh %67 : vector<16x128xf32>
    %c0_33 = arith.constant 0 : index
    %c0_34 = arith.constant 0 : index
    %69 = vector.load %arg8[%c0_33, %c0_34] : memref<16x128xf32, #tpu.memory_space<vmem>>, vector<16x128xf32>
    tpu.vector_store %arg8[%c0_33, %c0_34], %68 {strides = array<i32>} : memref<16x128xf32, #tpu.memory_space<vmem>>, vector<16x128xf32>,
    return
  }
  func.func @transform_0(%arg0: i32) -> (i32, i32) {
    %c0_i32 = arith.constant 0 : i32
    %c0_i32_0 = arith.constant 0 : i32
    return %arg0, %c0_i32 : i32, i32
  }
  func.func @transform_1(%arg0: i32) -> (i32, i32) {
    %c0_i32 = arith.constant 0 : i32
    %c0_i32_0 = arith.constant 0 : i32
    %c0_i32_1 = arith.constant 0 : i32
    return %c0_i32, %c0_i32_0 : i32, i32
  }
  func.func @transform_2(%arg0: i32) -> (i32, i32) {
    %c0_i32 = arith.constant 0 : i32
    %c0_i32_0 = arith.constant 0 : i32
    %c0_i32_1 = arith.constant 0 : i32
    return %c0_i32, %c0_i32_0 : i32, i32
  }
  func.func @transform_3(%arg0: i32) -> (i32, i32) {
    %c0_i32 = arith.constant 0 : i32
    %c0_i32_0 = arith.constant 0 : i32
    %c0_i32_1 = arith.constant 0 : i32
    return %c0_i32, %c0_i32_0 : i32, i32
  }
  func.func @transform_4(%arg0: i32) -> (i32, i32) {
    %c0_i32 = arith.constant 0 : i32
    %c0_i32_0 = arith.constant 0 : i32
    %c0_i32_1 = arith.constant 0 : i32
    return %c0_i32, %c0_i32_0 : i32, i32
  }
  func.func @transform_5(%arg0: i32) -> (i32, i32) {
    %c0_i32 = arith.constant 0 : i32
    %c0_i32_0 = arith.constant 0 : i32
    %c0_i32_1 = arith.constant 0 : i32
    return %c0_i32, %c0_i32_0 : i32, i32
  }
  func.func @transform_6(%arg0: i32) -> (i32, i32) {
    %c0_i32 = arith.constant 0 : i32
    %c0_i32_0 = arith.constant 0 : i32
    %c0_i32_1 = arith.constant 0 : i32
    return %c0_i32, %c0_i32_0 : i32, i32
  }
  func.func @transform_7(%arg0: i32) -> (i32, i32) {
    %c0_i32 = arith.constant 0 : i32
    %c0_i32_0 = arith.constant 0 : i32
    return %arg0, %c0_i32 : i32, i32
  }
}

</mosaic_0001>

<bundles_post_ra>
// kernel: actor_forward.1
= control target key start
LH: loop header
LB: loop body
LE: loop exit
PB: predicated region body
PF: predicated region fallthrough
CT: control target
= control target key end

     0   :  { %vm31_vm0 = vcmask 64512   ;;  %vm63_vm1 = vcmask 523264   ;;  %v308_v10 = vmov 64.0   ;;  %vm164_vm9 = vcmask 261120   ;;  %s439_s1 = inlined_call_operand.vmem [shape: f32[8,64], index: 1, kind: input, shape index: {}]   ;;  %s440_s0 = inlined_call_operand.vmem [shape: f32[16,8], index: 0, kind: input, shape index: {}]   ;;  %s441_s2 = inlined_call_operand.vmem [shape: f32[3,64], index: 2, kind: input, shape index: {}]   ;;  %s442_s4 = inlined_call_operand.vmem [shape: f32[3,32], index: 4, kind: input, shape index: {}]   ;;  %s443_s3 = inlined_call_operand.vmem [shape: f32[64,32], index: 3, kind: input, shape index: {}]   ;;  %s444_s6 = inlined_call_operand.vmem [shape: f32[1,128], index: 6, kind: input, shape index: {}]   ;;  %s445_s5 = inlined_call_operand.vmem [shape: f32[32,128], index: 5, kind: input, shape index: {}]   ;;  %s446_s7 = inlined_call_operand.vmem [shape: f32[16,128], index: 7, kind: output, shape index: {}]  }
   0x1   :  { %v28_v0 = vld [vmem:[%s439_s1] sm:$0xff]  ;;  %v27_v2 = vld [vmem:[%s440_s0 + $0x8] sm:$0xff]  ;;  %292 = vrcp.f32 %v308_v10  ;;  %v130_v27 = vld [vmem:[%s443_s3 + $0x38] sm:$0xff] }
   0x2   :  { %v26_v1 = vld [vmem:[%s440_s0] sm:$0xff]  ;;  %53 = vmatpush.msra.mxu0 %v28_v0  ;;  %147 = vmatpush.msra.mxu1 %v130_v27  ;;  %v129_v28 = vld [vmem:[%s443_s3 + $0x30] sm:$0xff]  ;;  %v128_v29 = vld [vmem:[%s443_s3 + $0x28] sm:$0xff] }
   0x3   :  { %269 = vmatmul.msk.f32.vlgmr.msra.gmra.mxu0 %vm31_vm0, %v26_v1  ;;  %v285_v3 = vld [vmem:[%s441_s2] ss:$0 sm:$0xff]  ;;  %275 = vmatpush.msra.mxu3 %v130_v27  ;;  %v126_v31 = vld [vmem:[%s443_s3 + $0x18] sm:$0xff]  ;;  %v125_v32 = vld [vmem:[%s443_s3 + $0x10] sm:$0xff] }
   0x4   :  { %148 = vmatpush.msra.mxu1 %v129_v28  ;;  %v127_v30 = vld [vmem:[%s443_s3 + $0x20] sm:$0xff]  ;;  %v124_v33 = vld [vmem:[%s443_s3 + $0x8] sm:$0xff] }
   0x5   :  { %276 = vmatpush.msra.mxu3 %v129_v28  ;;  %v123_v34 = vld [vmem:[%s443_s3] sm:$0xff]  ;;  %v225_v27 = vld [vmem:[%s445_s5 + $0x8] sm:$0xff] }
   0x6   :  { %149 = vmatpush.msra.mxu1 %v128_v29  ;;  %v286_v49 = vld [vmem:[%s441_s2 + $0x1] ss:$0 sm:$0xff]  ;;  %v287_v53 = vld [vmem:[%s441_s2 + $0x2] ss:$0 sm:$0xff]  ;;  %v288_v1 = vld [vmem:[%s442_s4] ss:$0 sm:$0xff] }
   0x7   :  { %v293_v11 = vpop.eup %292  ;;  %277 = vmatpush.msra.mxu3 %v128_v29  ;;  %v224_v28 = vld [vmem:[%s445_s5] sm:$0xff] }
   0x8   :  { %v71_v12 = vmul.f32 64.0, %v293_v11  ;;  %vm75_vm2 = vweird.f32 %v293_v11  ;;  %150 = vmatpush.msra.mxu1 %v127_v30 }
   0x9   :  { %278 = vmatpush.msra.mxu3 %v127_v30 }
   0xa   :  { %v72_v13 = vsub.f32 1.0, %v71_v12  ;;  %151 = vmatpush.msra.mxu1 %v126_v31 }
   0xb   :  { %270 = vmatmul.msk.f32.gmra.mxu0 %vm31_vm0, %v27_v2  ;;  %279 = vmatpush.msra.mxu3 %v126_v31 }
   0xc   :  { %v73_v14 = vmul.f32 %v293_v11, %v72_v13  ;;  %152 = vmatpush.msra.mxu1 %v125_v32 }
   0xd   :  { %280 = vmatpush.msra.mxu3 %v125_v32 }
   0xe   :  { %v74_v15 = vadd.f32 %v293_v11, %v73_v14  ;;  %153 = vmatpush.msra.mxu1 %v124_v33 }
   0xf   :  { %281 = vmatpush.msra.mxu3 %v124_v33 }
  0x10   :  { %v76_v16 = vsel %vm75_vm2, %v293_v11, %v74_v15  ;;  %154 = vmatpush.msra.mxu1 %v123_v34 }
  0x11   :  { %282 = vmatpush.msra.mxu3 %v123_v34 }
  0x80   :  { %v55_v4 = vpop.f32.mrf.mxu0 }
  0x81   :  { %v56_v5 = vadd.f32 %v285_v3, %v55_v4 }
  0x83   :  { %v64_v6 = vsel %vm63_vm1, %v56_v5, 0.0 }
  0x84   :  { %65 = vadd.xlane.f32.xlu0 %v64_v6 }
  0x88   :  { %v58_v7 = vpop.f32.mrf.mxu0 }
  0x89   :  { %v59_v8 = vadd.f32 %v285_v3, %v58_v7 }
  0x8b   :  { %v67_v9 = vsel %vm63_vm1, %v59_v8, 0.0 }
  0x8c   :  { %68 = vadd.xlane.f32.xlu0 %v67_v9 }
  0xf7   :  { %v66_v17 = vpop.xlane.xlu0 %65 }
  0xf8   :  { %v77_v18 = vmul.f32 %v76_v16, %v66_v17 }
  0xfa   :  { %v79_v19 = vsub.f32 %v56_v5, %v77_v18 }
  0xfc   :  { %v81_v20 = vmul.f32 %v79_v19, %v79_v19 }
  0xfe   :  { %v83_v21 = vsel %vm63_vm1, %v81_v20, 0.0 }
  0xff   :  { %84 = vadd.xlane.f32.xlu1 %v83_v21  ;;  %v69_v22 = vpop.xlane.xlu0 %68 }
 0x100   :  { %v78_v23 = vmul.f32 %v76_v16, %v69_v22 }
 0x102   :  { %v365_v24 = vsub.f32 %v59_v8, %v78_v23  ;;  %v309_v8 = vmov 32.0  }
 0x104   :  { %v82_v25 = vmul.f32 %v365_v24, %v365_v24 }
 0x106   :  { %v86_v26 = vsel %vm63_vm1, %v82_v25, 0.0  ;;  %v227_v25 = vld [vmem:[%s445_s5 + $0x18] sm:$0xff] }
 0x107   :  { %87 = vadd.xlane.f32.xlu1 %v86_v26  ;;  %250 = vmatpush.msra.mxu2 %v227_v25  ;;  %v226_v26 = vld [vmem:[%s445_s5 + $0x10] sm:$0xff] }
 0x109   :  { %251 = vmatpush.msra.mxu2 %v226_v26 }
 0x10b   :  { %252 = vmatpush.msra.mxu2 %v225_v27 }
 0x10d   :  { %253 = vmatpush.msra.mxu2 %v224_v28 }
 0x172   :  { %v85_v35 = vpop.xlane.xlu1 %84 }
 0x173   :  { %v89_v36 = vmul.f32 %v85_v35, %v76_v16 }
 0x175   :  { %v91_v37 = vadd.f32 1e-05, %v89_v36 }
 0x177   :  { %294 = vrsqrt.f32 %v91_v37  ;;  %vm99_vm4 = vweird.f32 %v91_v37 }
 0x17a   :  { %v88_v38 = vpop.xlane.xlu1 %87 }
 0x17b   :  { %v90_v39 = vmul.f32 %v88_v38, %v76_v16 }
 0x17d   :  { %v295_v40 = vpop.eup %294  ;;  %v92_v41 = vadd.f32 1e-05, %v90_v39 }
 0x17e   :  { %v94_v42 = vmul.f32 %v295_v40, %v91_v37  ;;  %vm100_vm3 = vweird.f32 %v295_v40 }
 0x17f   :  { %296 = vrsqrt.f32 %v92_v41  ;;  %vm101_vm5 = vmor %vm99_vm4, %vm100_vm3  ;;  %vm109_vm7 = vweird.f32 %v92_v41 }
 0x180   :  { %v95_v43 = vmul.f32 %v295_v40, %v94_v42  ;;  %298 = vrcp.f32 %v309_v8 }
 0x182   :  { %v96_v44 = vmul.f32 0.5, %v95_v43 }
 0x184   :  { %v97_v45 = vsub.f32 1.5, %v96_v44  ;;  %v290_v44 = vld [vmem:[%s442_s4 + $0x2] ss:$0 sm:$0xff] }
 0x185   :  { %v297_v46 = vpop.eup %296 }
 0x186   :  { %v98_v47 = vmul.f32 %v295_v40, %v97_v45  ;;  %v104_v48 = vmul.f32 %v297_v46, %v92_v41  ;;  %vm110_vm6 = vweird.f32 %v297_v46  ;;  %v299_v9 = vpop.eup %298  ;;  %v289_v41 = vld [vmem:[%s442_s4 + $0x1] ss:$0 sm:$0xff] }
 0x187   :  { %vm111_vm8 = vmor %vm109_vm7, %vm110_vm6  ;;  %v172_v10 = vmul.f32 32.0, %v299_v9  ;;  %vm176_vm10 = vweird.f32 %v299_v9 }
 0x188   :  { %v102_v50 = vsel %vm101_vm5, %v295_v40, %v98_v47  ;;  %v105_v51 = vmul.f32 %v297_v46, %v104_v48 }
 0x189   :  { %v113_v52 = vmul.f32 %v102_v50, %v79_v19  ;;  %v173_v11 = vsub.f32 1.0, %v172_v10 }
 0x18a   :  { %v106_v54 = vmul.f32 0.5, %v105_v51 }
 0x18b   :  { %v116_v55 = vmul.f32 %v286_v49, %v113_v52  ;;  %v174_v12 = vmul.f32 %v299_v9, %v173_v11 }
 0x18c   :  { %v107_v56 = vsub.f32 1.5, %v106_v54 }
 0x18d   :  { %v119_v57 = vadd.f32 %v287_v53, %v116_v55  ;;  %v175_v13 = vadd.f32 %v299_v9, %v174_v12 }
 0x18e   :  { %v108_v58 = vmul.f32 %v297_v46, %v107_v56 }
 0x18f   :  { %v121_v59 = vmax.f32 %v119_v57, 0.0  ;;  %v177_v14 = vsel %vm176_vm10, %v299_v9, %v175_v13 }
 0x190   :  { %v112_v60 = vsel %vm111_vm8, %v297_v46, %v108_v58 }
 0x191   :  { %271 = vmatmul.msk.f32.vlgmr.msra.gmra.mxu1 %vm63_vm1, %v121_v59  ;;  %v114_v61 = vmul.f32 %v112_v60, %v365_v24  ;;  %v291_v59 = vld [vmem:[%s444_s6] ss:$0 sm:$0xff] }
 0x193   :  { %v117_v62 = vmul.f32 %v286_v49, %v114_v61 }
 0x195   :  { %v120_v63 = vadd.f32 %v287_v53, %v117_v62 }
 0x197   :  { %v122_v0 = vmax.f32 %v120_v63, 0.0 }
 0x199   :  { %272 = vmatmul.msk.f32.vlgmr.msra.gmra.mxu3 %vm63_vm1, %v122_v0 }
 0x20e   :  { %v156_v2 = vpop.f32.mrf.mxu1 }
 0x20f   :  { %v157_v3 = vadd.f32 %v288_v1, %v156_v2 }
 0x211   :  { %v165_v4 = vsel %vm164_vm9, %v157_v3, 0.0 }
 0x212   :  { %166 = vadd.xlane.f32.xlu2 %v165_v4 }
 0x21c   :  { %v159_v5 = vpop.f32.mrf.mxu3 }
 0x21d   :  { %v160_v6 = vadd.f32 %v288_v1, %v159_v5 }
 0x21f   :  { %v168_v7 = vsel %vm164_vm9, %v160_v6, 0.0 }
 0x220   :  { %169 = vadd.xlane.f32.xlu2 %v168_v7 }
 0x285   :  { %v167_v15 = vpop.xlane.xlu2 %166 }
 0x286   :  { %v178_v16 = vmul.f32 %v177_v14, %v167_v15 }
 0x288   :  { %v180_v17 = vsub.f32 %v157_v3, %v178_v16 }
 0x28a   :  { %v182_v18 = vmul.f32 %v180_v17, %v180_v17 }
 0x28c   :  { %v184_v19 = vsel %vm164_vm9, %v182_v18, 0.0 }
 0x28d   :  { %185 = vadd.xlane.f32.xlu0 %v184_v19 }
 0x293   :  { %v170_v20 = vpop.xlane.xlu2 %169 }
 0x294   :  { %v179_v21 = vmul.f32 %v177_v14, %v170_v20 }
 0x296   :  { %v181_v22 = vsub.f32 %v160_v6, %v179_v21 }
 0x298   :  { %v183_v23 = vmul.f32 %v181_v22, %v181_v22 }
 0x29a   :  { %v187_v24 = vsel %vm164_vm9, %v183_v23, 0.0 }
 0x29b   :  { %188 = vadd.xlane.f32.xlu1 %v187_v24 }
 0x300   :  { %v186_v29 = vpop.xlane.xlu0 %185 }
 0x301   :  { %v190_v30 = vmul.f32 %v186_v29, %v177_v14 }
 0x303   :  { %v192_v31 = vadd.f32 1e-05, %v190_v30 }
 0x305   :  { %300 = vrsqrt.f32 %v192_v31  ;;  %vm200_vm12 = vweird.f32 %v192_v31 }
 0x30b   :  { %v301_v32 = vpop.eup %300 }
 0x30c   :  { %v195_v33 = vmul.f32 %v301_v32, %v192_v31  ;;  %vm201_vm11 = vweird.f32 %v301_v32 }
 0x30d   :  { %vm202_vm13 = vmor %vm200_vm12, %vm201_vm11 }
 0x30e   :  { %v196_v34 = vmul.f32 %v301_v32, %v195_v33  ;;  %v189_v35 = vpop.xlane.xlu1 %188 }
 0x30f   :  { %v191_v36 = vmul.f32 %v189_v35, %v177_v14 }
 0x310   :  { %v197_v37 = vmul.f32 0.5, %v196_v34 }
 0x311   :  { %v193_v38 = vadd.f32 1e-05, %v191_v36 }
 0x312   :  { %v198_v39 = vsub.f32 1.5, %v197_v37 }
 0x313   :  { %302 = vrsqrt.f32 %v193_v38  ;;  %vm210_vm15 = vweird.f32 %v193_v38 }
 0x314   :  { %v199_v40 = vmul.f32 %v301_v32, %v198_v39 }
 0x316   :  { %v203_v42 = vsel %vm202_vm13, %v301_v32, %v199_v40 }
 0x317   :  { %v214_v43 = vmul.f32 %v203_v42, %v180_v17 }
 0x319   :  { %v303_v45 = vpop.eup %302  ;;  %v217_v46 = vmul.f32 %v289_v41, %v214_v43 }
 0x31a   :  { %v205_v47 = vmul.f32 %v303_v45, %v193_v38  ;;  %vm211_vm14 = vweird.f32 %v303_v45 }
 0x31b   :  { %v220_v48 = vadd.f32 %v290_v44, %v217_v46  ;;  %vm212_vm0 = vmor %vm210_vm15, %vm211_vm14 }
 0x31c   :  { %v206_v49 = vmul.f32 %v303_v45, %v205_v47 }
 0x31d   :  { %v222_v50 = vmax.f32 %v220_v48, 0.0 }
 0x31e   :  { %v207_v51 = vmul.f32 0.5, %v206_v49 }
 0x31f   :  { %273 = vmatmul.msk.f32.vlgmr.msra.gmra.mxu2 %vm164_vm9, %v222_v50 }
 0x320   :  { %v208_v52 = vsub.f32 1.5, %v207_v51 }
 0x322   :  { %v209_v53 = vmul.f32 %v303_v45, %v208_v52 }
 0x324   :  { %v213_v54 = vsel %vm212_vm0, %v303_v45, %v209_v53 }
 0x325   :  { %v215_v55 = vmul.f32 %v213_v54, %v181_v22 }
 0x327   :  { %v218_v56 = vmul.f32 %v289_v41, %v215_v55 }
 0x329   :  { %v221_v57 = vadd.f32 %v290_v44, %v218_v56 }
 0x32b   :  { %v223_v58 = vmax.f32 %v221_v57, 0.0 }
 0x32d   :  { %274 = vmatmul.msk.f32.gmra.mxu2 %vm164_vm9, %v223_v58 }
 0x3a2   :  { %v255_v60 = vpop.f32.mrf.mxu2 }
 0x3a3   :  { %v256_v61 = vadd.f32 %v291_v59, %v255_v60 }
 0x3a5   :  { %304 = vtanh.f32 %v256_v61 }
 0x3ab   :  { %v305_v62 = vpop.eup %304 }
 0x3ac   :  { %263 = vst [vmem:[%s446_s7] sm:$0xff] %v305_v62 }
 0x3b0   :  { %v258_v63 = vpop.f32.mrf.mxu2 }
 0x3b1   :  { %v259_v0 = vadd.f32 %v291_v59, %v258_v63 }
 0x3b3   :  { %306 = vtanh.f32 %v259_v0 }
 0x3b9   :  { %v307_v1 = vpop.eup %306 }
 0x3ba   :  { %264 = vst [vmem:[%s446_s7 + $0x8] sm:$0xff] %v307_v1 }

</bundles_post_ra>
